<compile_context>
chip_gen: v7x
topology: tpu7x:2x2x1
jax: 0.10.0
libtpu: 0.0.40
codegen_flags: <defaults>
</compile_context>

<pallas_src>
import jax
import jax.numpy as jnp
from jax.experimental import pallas as pl
from jax.experimental.pallas import tpu as pltpu

EMBED_DIM = 32
NUM_USERS = 64
NUM_ITEMS = 128
BATCH = 8
NUM_NEGS = 8

# UltraGCN hyper-parameters (deterministic, synthetic config)
W1, W2, W3, W4 = 1e-6, 1.0, 1e-6, 1.0
NEGATIVE_WEIGHT = 10.0
GAMMA = 1e-4
# TODO(synk): UltraGCN's item-item term (lambda * cal_loss_I) needs the
# ii_constraint_mat / ii_neighbor_mat produced by data_param_prepare, which is
# not part of the provided module; it is omitted here (lambda = 0).


# ----------------------------------------------------------------------------
# Fully fused UltraGCN forward:
#   gathers (one-hot) + scores (MXU) + get_omegas + cal_loss_L + norm_loss
# ----------------------------------------------------------------------------
def _ultragcn_forward_kernel(uid_ref, pid_ref, nid_ref,
                             ut_ref, it_ref, bu_ref, bi_ref, loss_ref):
    ut = ut_ref[...]                          # [NU, D] user embedding table
    it = it_ref[...]                          # [NI, D] item embedding table
    uid = uid_ref[...]                        # [B, 1]  int32 user ids
    pid = pid_ref[...]                        # [B, 1]  int32 positive item ids
    nid = nid_ref[...]                        # [B, N]  int32 negative item ids

    b = uid.shape[0]
    nu = ut.shape[0]
    ni = it.shape[0]
    n_negs = nid.shape[1]

    # --- user-row gather as a one-hot matmul (MXU) + beta_uD gather ----------
    u_oh = (uid == jax.lax.broadcasted_iota(jnp.int32, (b, nu), 1)
            ).astype(jnp.float32)                                    # [B, NU]
    u = jnp.dot(u_oh, ut, preferred_element_type=jnp.float32)        # [B, D]
    bu = jnp.sum(u_oh * bu_ref[...], axis=1, keepdims=True)          # [B, 1]

    # --- scores of each batch user against the whole (tiny) item table (MXU) -
    scores_all = jax.lax.dot_general(
        u, it, dimension_numbers=(((1,), (1,)), ((), ())),
        preferred_element_type=jnp.float32)                          # [B, NI]

    # --- positive / negative selection + beta_iD gathers via one-hot masks ---
    p_oh = (pid == jax.lax.broadcasted_iota(jnp.int32, (b, ni), 1)
            ).astype(jnp.float32)                                    # [B, NI]
    pos_scores = jnp.sum(p_oh * scores_all, axis=1, keepdims=True)   # [B, 1]
    bi_pos = jnp.sum(p_oh * bi_ref[...], axis=1, keepdims=True)      # [B, 1]

    n_oh = (nid[:, :, None] ==
            jax.lax.broadcasted_iota(jnp.int32, (b, n_negs, ni), 2)
            ).astype(jnp.float32)                                    # [B, N, NI]
    neg_scores = jnp.sum(n_oh * scores_all[:, None, :], axis=-1)     # [B, N]
    bi_neg = jnp.sum(n_oh * bi_ref[...][None, :, :], axis=-1)        # [B, N]

    # --- UltraGCN cal_loss_L with get_omegas fused in -------------------------
    #   pos:  (W1 + W2*bu*bi) * softplus(-s_pos), summed over batch
    #   neg:  NEGATIVE_WEIGHT * mean_n[(W3 + W4*bu*bi) * softplus(s_neg)], summed
    pos_term = jnp.sum((W1 + W2 * bu * bi_pos) * jnp.logaddexp(-pos_scores, 0.0),
                       axis=(0, 1), keepdims=True)                   # (1, 1)
    neg_term = (NEGATIVE_WEIGHT / n_negs) * jnp.sum(
        (W3 + W4 * bu * bi_neg) * jnp.logaddexp(neg_scores, 0.0),
        axis=(0, 1), keepdims=True)                                  # (1, 1)

    # --- norm_loss(): 0.5 * sum of squares of both tables (rows already in
    #     VMEM for the score matmul -> no extra HBM traffic / extra launch) ----
    norm = 0.5 * (jnp.sum(ut * ut, axis=(0, 1), keepdims=True)
                  + jnp.sum(it * it, axis=(0, 1), keepdims=True))    # (1, 1)

    loss_ref[...] = pos_term + neg_term + GAMMA * norm


@jax.jit
def ultragcn_forward(user_embeds, item_embeds, beta_u_row, beta_i_row,
                     users, pos_items, neg_items):
    b = users.shape[0]
    uid = users.reshape(b, 1).astype(jnp.int32)
    pid = pos_items.reshape(b, 1).astype(jnp.int32)
    nid = neg_items.astype(jnp.int32)
    out = pl.pallas_call(
        _ultragcn_forward_kernel,
        out_shape=jax.ShapeDtypeStruct((1, 1), jnp.float32),
        in_specs=[pl.BlockSpec(memory_space=pltpu.MemorySpace.VMEM)] * 7,
        out_specs=pl.BlockSpec(memory_space=pltpu.MemorySpace.VMEM),
    )(uid, pid, nid, user_embeds, item_embeds, beta_u_row, beta_i_row)
    return out[0, 0]


# ----------------------------------------------------------------------------
# transform_embeddings: user & item nn.Linear fused into ONE un-gridded call.
# Weights arrive pre-transposed to [in, out]; biases pre-shaped to [1, out].
# ----------------------------------------------------------------------------
def _dual_linear_kernel(xu_ref, wu_ref, bu_ref, xi_ref, wi_ref, bi_ref,
                        ou_ref, oi_ref):
    ou_ref[...] = (jnp.dot(xu_ref[...], wu_ref[...],
                           preferred_element_type=jnp.float32) + bu_ref[...])
    oi_ref[...] = (jnp.dot(xi_ref[...], wi_ref[...],
                           preferred_element_type=jnp.float32) + bi_ref[...])


@jax.jit
def pallas_dual_linear(xu, wu_t, bu_row, xi, wi_t, bi_row):
    nu, d = xu.shape
    ni, _ = xi.shape
    return pl.pallas_call(
        _dual_linear_kernel,
        out_shape=(jax.ShapeDtypeStruct((nu, d), jnp.float32),
                   jax.ShapeDtypeStruct((ni, d), jnp.float32)),
        in_specs=[pl.BlockSpec(memory_space=pltpu.MemorySpace.VMEM)] * 6,
        out_specs=(pl.BlockSpec(memory_space=pltpu.MemorySpace.VMEM),
                   pl.BlockSpec(memory_space=pltpu.MemorySpace.VMEM)),
    )(xu, wu_t, bu_row, xi, wi_t, bi_row)


# ----------------------------------------------------------------------------
# CascadeModel wrapper (parameter setup only; forward is a single pallas_call)
# ----------------------------------------------------------------------------
class CascadeModelPallas:
    BEHAVIORS = ('view', 'fav', 'cart', 'buy')

    def __init__(self, key):
        n_keys = 4 * len(self.BEHAVIORS) + 2 * (len(self.BEHAVIORS) - 1)
        keys = jax.random.split(key, n_keys)
        k = iter(range(len(keys)))
        self.params = {}
        for behavior in self.BEHAVIORS:
            self.params[behavior] = {
                'user_embeds': 1e-2 * jax.random.normal(
                    keys[next(k)], (NUM_USERS, EMBED_DIM), jnp.float32),
                'item_embeds': 1e-2 * jax.random.normal(
                    keys[next(k)], (NUM_ITEMS, EMBED_DIM), jnp.float32),
                # betas stored lane-major (1, N) once -> no per-call reshape.
                'beta_uD': jax.random.uniform(
                    keys[next(k)], (1, NUM_USERS), jnp.float32, 0.1, 1.0),
                'beta_iD': jax.random.uniform(
                    keys[next(k)], (1, NUM_ITEMS), jnp.float32, 0.1, 1.0),
            }
        self.transforms = {}
        scale = 1.0 / jnp.sqrt(EMBED_DIM)
        for behavior in self.BEHAVIORS[:-1]:
            # PyTorch nn.Linear weight is [out, in]; pre-transpose ONCE to the
            # MXU-canonical [in, out] layout, pre-shape bias to [1, out].
            wu = scale * jax.random.normal(
                keys[next(k)], (EMBED_DIM, EMBED_DIM), jnp.float32)
            wi = scale * jax.random.normal(
                keys[next(k)], (EMBED_DIM, EMBED_DIM), jnp.float32)
            self.transforms[behavior] = {
                'user_wT': wu.T,
                'user_b': jnp.zeros((1, EMBED_DIM), jnp.float32),
                'item_wT': wi.T,
                'item_b': jnp.zeros((1, EMBED_DIM), jnp.float32),
            }

    def forward(self, behavior, users, pos_items, neg_items):
        p = self.params[behavior]
        return ultragcn_forward(p['user_embeds'], p['item_embeds'],
                                p['beta_uD'], p['beta_iD'],
                                users, pos_items, neg_items)

    def get_embeddings(self, behavior, users=None, items=None):
        p = self.params[behavior]
        ue = p['user_embeds'] if users is None else p['user_embeds'][users]
        ie = p['item_embeds'] if items is None else p['item_embeds'][items]
        return ue, ie

    def transform_embeddings(self, behavior, user_embeds, item_embeds):
        if behavior in self.transforms:
            t = self.transforms[behavior]
            user_embeds, item_embeds = pallas_dual_linear(
                user_embeds, t['user_wT'], t['user_b'],
                item_embeds, t['item_wT'], t['item_b'])
        return user_embeds, item_embeds


# ----------------------------------------------------------------------------
# Pure-JAX reference of the UltraGCN loss (silent correctness check)
# ----------------------------------------------------------------------------
def _reference_loss(p, users, pos_items, neg_items):
    ue = p['user_embeds'][users]
    pe = p['item_embeds'][pos_items]
    ne = p['item_embeds'][neg_items]
    bu = p['beta_uD'][0][users]
    bip = p['beta_iD'][0][pos_items]
    bin_ = p['beta_iD'][0][neg_items]
    pos_scores = jnp.sum(ue * pe, axis=-1)
    neg_scores = jnp.sum(ue[:, None, :] * ne, axis=-1)
    pos_w = W1 + W2 * bu * bip
    neg_w = W3 + W4 * bu[:, None] * bin_
    pos_loss = pos_w * jnp.logaddexp(-pos_scores, 0.0)
    neg_loss = jnp.mean(neg_w * jnp.logaddexp(neg_scores, 0.0), axis=-1)
    loss_l = jnp.sum(pos_loss + NEGATIVE_WEIGHT * neg_loss)
    norm = 0.5 * (jnp.sum(p['user_embeds'] ** 2) + jnp.sum(p['item_embeds'] ** 2))
    return loss_l + GAMMA * norm


if __name__ == "__main__":
    root = jax.random.PRNGKey(0)
    k_model, k_u, k_p, k_n = jax.random.split(root, 4)

    model = CascadeModelPallas(k_model)

    users = jax.random.randint(k_u, (BATCH,), 0, NUM_USERS)
    pos_items = jax.random.randint(k_p, (BATCH,), 0, NUM_ITEMS)
    neg_items = jax.random.randint(k_n, (BATCH, NUM_NEGS), 0, NUM_ITEMS)

    # forward: UltraGCN loss for the 'view' behavior model (single pallas_call)
    loss = model.forward('view', users, pos_items, neg_items)

    # cascade step: fetch embeddings and run the fused per-behavior transform
    ue, ie = model.get_embeddings('view', users, pos_items)
    ue_t, ie_t = model.transform_embeddings('view', ue, ie)
    jax.block_until_ready((loss, ue_t, ie_t))

    # silent correctness checks against pure-JAX references
    p = model.params['view']
    t = model.transforms['view']
    ref_loss = _reference_loss(p, users, pos_items, neg_items)
    ue_ref = ue @ t['user_wT'] + t['user_b'][0]
    ie_ref = ie @ t['item_wT'] + t['item_b'][0]
    assert jnp.allclose(loss, ref_loss, rtol=1e-3, atol=1e-3)
    assert jnp.allclose(ue_t, ue_ref, rtol=1e-3, atol=1e-4)
    assert jnp.allclose(ie_t, ie_ref, rtol=1e-3, atol=1e-4)

    print("KERNEL_OK")
</pallas_src>

<mosaic_0001>
module attributes {stable_mosaic.version = 11 : i64} {
  func.func @_ultragcn_forward_kernel(%arg0: memref<8x1xi32, #tpu.memory_space<vmem>>, %arg1: memref<8x1xi32, #tpu.memory_space<vmem>>, %arg2: memref<8x8xi32, #tpu.memory_space<vmem>>, %arg3: memref<64x32xf32, #tpu.memory_space<vmem>>, %arg4: memref<128x32xf32, #tpu.memory_space<vmem>>, %arg5: memref<1x64xf32, #tpu.memory_space<vmem>>, %arg6: memref<1x128xf32, #tpu.memory_space<vmem>>, %arg7: memref<1x1xf32, #tpu.memory_space<vmem>>) attributes {dimension_semantics = [], scalar_prefetch = 0 : i64, scratch_operands = 0 : i64, tpu.core_type = #tpu.core_type<tc>} {
    %c0 = arith.constant 0 : index
    %c0_0 = arith.constant 0 : index
    %0 = vector.load %arg3[%c0, %c0_0] : memref<64x32xf32, #tpu.memory_space<vmem>>, vector<64x32xf32>
    %c0_1 = arith.constant 0 : index
    %c0_2 = arith.constant 0 : index
    %1 = vector.load %arg4[%c0_1, %c0_2] : memref<128x32xf32, #tpu.memory_space<vmem>>, vector<128x32xf32>
    %c0_3 = arith.constant 0 : index
    %c0_4 = arith.constant 0 : index
    %2 = vector.load %arg0[%c0_3, %c0_4] : memref<8x1xi32, #tpu.memory_space<vmem>>, vector<8x1xi32>
    %c0_5 = arith.constant 0 : index
    %c0_6 = arith.constant 0 : index
    %3 = vector.load %arg1[%c0_5, %c0_6] : memref<8x1xi32, #tpu.memory_space<vmem>>, vector<8x1xi32>
    %c0_7 = arith.constant 0 : index
    %c0_8 = arith.constant 0 : index
    %4 = vector.load %arg2[%c0_7, %c0_8] : memref<8x8xi32, #tpu.memory_space<vmem>>, vector<8x8xi32>
    %5 = tpu.iota {dimensions = array<i32: 1>} : vector<8x64xi32>
    %6 = vector.broadcast %2 : vector<8x1xi32> to vector<8x64xi32>
    %7 = arith.cmpi eq, %6, %5 : vector<8x64xi32>
    %8 = arith.extui %7 : vector<8x64xi1> to vector<8x64xi32>
    %9 = arith.sitofp %8 : vector<8x64xi32> to vector<8x64xf32>
    %cst = arith.constant dense<0.000000e+00> : vector<8x32xf32>
    %10 = tpu.matmul %9, %0, %cst {dimension_numbers = #tpu.dot_dimension_numbers<[1], [0], [0], [1], [0, 0, 1, 1], [], []>} : vector<8x64xf32>, vector<64x32xf32>, vector<8x32xf32> -> vector<8x32xf32>
    %c0_9 = arith.constant 0 : index
    %c0_10 = arith.constant 0 : index
    %11 = vector.load %arg5[%c0_9, %c0_10] : memref<1x64xf32, #tpu.memory_space<vmem>>, vector<1x64xf32>
    %12 = vector.broadcast %11 : vector<1x64xf32> to vector<8x64xf32>
    %13 = arith.mulf %9, %12 : vector<8x64xf32>
    %cst_11 = arith.constant dense<0.000000e+00> : vector<8xf32>
    %14 = vector.multi_reduction <add>, %13, %cst_11 [1] : vector<8x64xf32> to vector<8xf32>
    %15 = vector.shape_cast %14 : vector<8xf32> to vector<8x1xf32>
    %cst_12 = arith.constant dense<0.000000e+00> : vector<8x128xf32>
    %16 = tpu.matmul %10, %1, %cst_12 {dimension_numbers = #tpu.dot_dimension_numbers<[1], [1], [0], [0], [0, 0, 1, 0], [], []>} : vector<8x32xf32>, vector<128x32xf32>, vector<8x128xf32> -> vector<8x128xf32>
    %17 = tpu.iota {dimensions = array<i32: 1>} : vector<8x128xi32>
    %18 = vector.broadcast %3 : vector<8x1xi32> to vector<8x128xi32>
    %19 = arith.cmpi eq, %18, %17 : vector<8x128xi32>
    %20 = arith.extui %19 : vector<8x128xi1> to vector<8x128xi32>
    %21 = arith.sitofp %20 : vector<8x128xi32> to vector<8x128xf32>
    %22 = arith.mulf %21, %16 : vector<8x128xf32>
    %cst_13 = arith.constant dense<0.000000e+00> : vector<8xf32>
    %23 = vector.multi_reduction <add>, %22, %cst_13 [1] : vector<8x128xf32> to vector<8xf32>
    %24 = vector.shape_cast %23 : vector<8xf32> to vector<8x1xf32>
    %c0_14 = arith.constant 0 : index
    %c0_15 = arith.constant 0 : index
    %25 = vector.load %arg6[%c0_14, %c0_15] : memref<1x128xf32, #tpu.memory_space<vmem>>, vector<1x128xf32>
    %26 = vector.broadcast %25 : vector<1x128xf32> to vector<8x128xf32>
    %27 = arith.mulf %21, %26 : vector<8x128xf32>
    %cst_16 = arith.constant dense<0.000000e+00> : vector<8xf32>
    %28 = vector.multi_reduction <add>, %27, %cst_16 [1] : vector<8x128xf32> to vector<8xf32>
    %29 = vector.shape_cast %28 : vector<8xf32> to vector<8x1xf32>
    %30 = vector.shape_cast %4 : vector<8x8xi32> to vector<8x8x1xi32>
    %31 = tpu.iota {dimensions = array<i32: 2>} : vector<8x8x128xi32>
    %32 = vector.broadcast %30 : vector<8x8x1xi32> to vector<8x8x128xi32>
    %33 = arith.cmpi eq, %32, %31 : vector<8x8x128xi32>
    %34 = arith.extui %33 : vector<8x8x128xi1> to vector<8x8x128xi32>
    %35 = arith.sitofp %34 : vector<8x8x128xi32> to vector<8x8x128xf32>
    %36 = vector.shape_cast %16 : vector<8x128xf32> to vector<8x1x128xf32>
    %37 = vector.broadcast %36 : vector<8x1x128xf32> to vector<8x8x128xf32>
    %38 = arith.mulf %35, %37 : vector<8x8x128xf32>
    %cst_17 = arith.constant dense<0.000000e+00> : vector<8x8xf32>
    %39 = vector.multi_reduction <add>, %38, %cst_17 [2] : vector<8x8x128xf32> to vector<8x8xf32>
    %c0_18 = arith.constant 0 : index
    %c0_19 = arith.constant 0 : index
    %40 = vector.load %arg6[%c0_18, %c0_19] : memref<1x128xf32, #tpu.memory_space<vmem>>, vector<1x128xf32>
    %41 = vector.shape_cast %40 : vector<1x128xf32> to vector<1x1x128xf32>
    %42 = vector.broadcast %41 : vector<1x1x128xf32> to vector<8x8x128xf32>
    %43 = arith.mulf %35, %42 : vector<8x8x128xf32>
    %cst_20 = arith.constant dense<0.000000e+00> : vector<8x8xf32>
    %44 = vector.multi_reduction <add>, %43, %cst_20 [2] : vector<8x8x128xf32> to vector<8x8xf32>
    %cst_21 = arith.constant 1.000000e+00 : f32
    %45 = vector.broadcast %cst_21 : f32 to vector<8x1xf32>
    %46 = arith.mulf %45, %15 : vector<8x1xf32>
    %47 = arith.mulf %46, %29 : vector<8x1xf32>
    %cst_22 = arith.constant 9.99999997E-7 : f32
    %48 = vector.broadcast %cst_22 : f32 to vector<8x1xf32>
    %49 = arith.addf %48, %47 : vector<8x1xf32>
    %cst_23 = arith.constant 0.000000e+00 : f32
    %50 = vector.broadcast %cst_23 : f32 to vector<8x1xf32>
    %51 = arith.subf %50, %24 : vector<8x1xf32>
    %cst_24 = arith.constant 0.000000e+00 : f32
    %52 = vector.broadcast %cst_24 : f32 to vector<8x1xf32>
    %53 = arith.maximumf %51, %52 : vector<8x1xf32>
    %54 = vector.broadcast %cst_24 : f32 to vector<8x1xf32>
    %55 = arith.subf %51, %54 : vector<8x1xf32>
    %56 = arith.cmpf one, %55, %55 : vector<8x1xf32>
    %57 = vector.broadcast %cst_24 : f32 to vector<8x1xf32>
    %58 = arith.addf %51, %57 : vector<8x1xf32>
    %59 = math.absf %55 : vector<8x1xf32>
    %cst_25 = arith.constant 0.000000e+00 : f32
    %60 = vector.broadcast %cst_25 : f32 to vector<8x1xf32>
    %61 = arith.subf %60, %59 : vector<8x1xf32>
    %62 = math.exp %61 : vector<8x1xf32>
    %63 = math.log1p %62 : vector<8x1xf32>
    %64 = arith.addf %53, %63 : vector<8x1xf32>
    %65 = arith.select %56, %58, %64 : vector<8x1xi1>, vector<8x1xf32>
    %66 = arith.mulf %49, %65 : vector<8x1xf32>
    %67 = vector.shape_cast %66 : vector<8x1xf32> to vector<1x8x1xf32>
    %cst_26 = arith.constant dense<0.000000e+00> : vector<1xf32>
    %68 = vector.multi_reduction <add>, %67, %cst_26 [1, 2] : vector<1x8x1xf32> to vector<1xf32>
    %69 = vector.shape_cast %68 : vector<1xf32> to vector<1x1x1xf32>
    %70 = vector.extract %69[0, 0, 0] : f32 from vector<1x1x1xf32>
    %71 = vector.broadcast %70 : f32 to vector<1x1xf32>
    %cst_27 = arith.constant 1.000000e+00 : f32
    %72 = vector.broadcast %cst_27 : f32 to vector<8x1xf32>
    %73 = arith.mulf %72, %15 : vector<8x1xf32>
    %74 = vector.broadcast %73 : vector<8x1xf32> to vector<8x8xf32>
    %75 = arith.mulf %74, %44 : vector<8x8xf32>
    %cst_28 = arith.constant 9.99999997E-7 : f32
    %76 = vector.broadcast %cst_28 : f32 to vector<8x8xf32>
    %77 = arith.addf %76, %75 : vector<8x8xf32>
    %cst_29 = arith.constant 0.000000e+00 : f32
    %78 = vector.broadcast %cst_29 : f32 to vector<8x8xf32>
    %79 = arith.maximumf %39, %78 : vector<8x8xf32>
    %80 = vector.broadcast %cst_29 : f32 to vector<8x8xf32>
    %81 = arith.subf %39, %80 : vector<8x8xf32>
    %82 = arith.cmpf one, %81, %81 : vector<8x8xf32>
    %83 = vector.broadcast %cst_29 : f32 to vector<8x8xf32>
    %84 = arith.addf %39, %83 : vector<8x8xf32>
    %85 = math.absf %81 : vector<8x8xf32>
    %cst_30 = arith.constant 0.000000e+00 : f32
    %86 = vector.broadcast %cst_30 : f32 to vector<8x8xf32>
    %87 = arith.subf %86, %85 : vector<8x8xf32>
    %88 = math.exp %87 : vector<8x8xf32>
    %89 = math.log1p %88 : vector<8x8xf32>
    %90 = arith.addf %79, %89 : vector<8x8xf32>
    %91 = arith.select %82, %84, %90 : vector<8x8xi1>, vector<8x8xf32>
    %92 = arith.mulf %77, %91 : vector<8x8xf32>
    %93 = vector.shape_cast %92 : vector<8x8xf32> to vector<1x8x8xf32>
    %cst_31 = arith.constant dense<0.000000e+00> : vector<1xf32>
    %94 = vector.multi_reduction <add>, %93, %cst_31 [1, 2] : vector<1x8x8xf32> to vector<1xf32>
    %95 = vector.shape_cast %94 : vector<1xf32> to vector<1x1x1xf32>
    %96 = vector.extract %95[0, 0, 0] : f32 from vector<1x1x1xf32>
    %97 = vector.broadcast %96 : f32 to vector<1x1xf32>
    %cst_32 = arith.constant 1.250000e+00 : f32
    %98 = vector.broadcast %cst_32 : f32 to vector<1x1xf32>
    %99 = arith.mulf %98, %97 : vector<1x1xf32>
    %100 = arith.mulf %0, %0 : vector<64x32xf32>
    %101 = vector.shape_cast %100 : vector<64x32xf32> to vector<1x64x32xf32>
    %cst_33 = arith.constant dense<0.000000e+00> : vector<1xf32>
    %102 = vector.multi_reduction <add>, %101, %cst_33 [1, 2] : vector<1x64x32xf32> to vector<1xf32>
    %103 = vector.shape_cast %102 : vector<1xf32> to vector<1x1x1xf32>
    %104 = vector.extract %103[0, 0, 0] : f32 from vector<1x1x1xf32>
    %105 = vector.broadcast %104 : f32 to vector<1x1xf32>
    %106 = arith.mulf %1, %1 : vector<128x32xf32>
    %107 = vector.shape_cast %106 : vector<128x32xf32> to vector<1x128x32xf32>
    %cst_34 = arith.constant dense<0.000000e+00> : vector<1xf32>
    %108 = vector.multi_reduction <add>, %107, %cst_34 [1, 2] : vector<1x128x32xf32> to vector<1xf32>
    %109 = vector.shape_cast %108 : vector<1xf32> to vector<1x1x1xf32>
    %110 = vector.extract %109[0, 0, 0] : f32 from vector<1x1x1xf32>
    %111 = vector.broadcast %110 : f32 to vector<1x1xf32>
    %112 = arith.addf %105, %111 : vector<1x1xf32>
    %cst_35 = arith.constant 5.000000e-01 : f32
    %113 = vector.broadcast %cst_35 : f32 to vector<1x1xf32>
    %114 = arith.mulf %113, %112 : vector<1x1xf32>
    %115 = arith.addf %71, %99 : vector<1x1xf32>
    %cst_36 = arith.constant 9.99999974E-5 : f32
    %116 = vector.broadcast %cst_36 : f32 to vector<1x1xf32>
    %117 = arith.mulf %116, %114 : vector<1x1xf32>
    %118 = arith.addf %115, %117 : vector<1x1xf32>
    %c0_37 = arith.constant 0 : index
    %c0_38 = arith.constant 0 : index
    %119 = vector.load %arg7[%c0_37, %c0_38] : memref<1x1xf32, #tpu.memory_space<vmem>>, vector<1x1xf32>
    tpu.vector_store %arg7[%c0_37, %c0_38], %118 {strides = array<i32>} : memref<1x1xf32, #tpu.memory_space<vmem>>, vector<1x1xf32>,
    return
  }
}

</mosaic_0001>

<bundles_post_ra>
// kernel: ultragcn_forward.1
= control target key start
LH: loop header
LB: loop body
LE: loop exit
PB: predicated region body
PF: predicated region fallthrough
CT: control target
= control target key end

     0   :  { %v1143_v2 = vmov 0   ;;  %v1144_v3 = vmov 0.0|0.0   ;;  %vm147_vm0 = vcmask 261120   ;;  %s1683_s0 = inlined_call_operand.vmem [shape: s32[8,1], index: 0, kind: input, shape index: {}]   ;;  %s1684_s1 = inlined_call_operand.vmem [shape: s32[8,1], index: 1, kind: input, shape index: {}]   ;;  %s1685_s2 = inlined_call_operand.vmem [shape: s32[8,8], index: 2, kind: input, shape index: {}]   ;;  %s1686_s3 = inlined_call_operand.vmem [shape: f32[64,32], index: 3, kind: input, shape index: {}]   ;;  %s1687_s4 = inlined_call_operand.vmem [shape: f32[128,32], index: 4, kind: input, shape index: {}]   ;;  %s1688_s5 = inlined_call_operand.vmem [shape: f32[1,64], index: 5, kind: input, shape index: {}]   ;;  %s1689_s6 = inlined_call_operand.vmem [shape: f32[1,128], index: 6, kind: input, shape index: {}]   ;;  %s1690_s7 = inlined_call_operand.hbm [shape: f32[1,1], index: 7, kind: output, shape index: {}]  }
   0x1   :  { %v51_v0 = vld [vmem:[%s1683_s0] sm:$0xff]  ;;  %1082 = vset.pattern.permute.xlu0 %v1143_v2  ;;  %1024 = vmatprep.subr.bf16.mxu0 %v1144_v3  ;;  %v28_v4 = vld [vmem:[%s1686_s3 + $0x8] sm:$0xff]  ;;  %v29_v6 = vld [vmem:[%s1686_s3 + $0x10] sm:$0xff] }
   0x2   :  { %v27_v1 = vld [vmem:[%s1686_s3] sm:$0xff]  ;;  %v30_v7 = vld [vmem:[%s1686_s3 + $0x18] sm:$0xff]  ;;  %57 = vperm.xlu0 %1082, %v51_v0   ;;  %v804_v9 = vmul.f32 %v28_v4, %v28_v4  ;;  %v805_v10 = vmul.f32 %v29_v6, %v29_v6  ;;  %1036 = vmatprep.subr.bf16.mxu1 %v1144_v3 }
   0x3   :  { %v803_v5 = vmul.f32 %v27_v1, %v27_v1  ;;  %v1025_v8 = vpack.c.bf16 %v28_v4, %v27_v1  ;;  %v52_v11 = vld [vmem:[%s1684_s1] sm:$0xff]  ;;  %v806_v13 = vmul.f32 %v30_v7, %v30_v7 }
   0x5   :  { %v811_v12 = vsel %vm147_vm0, %v803_v5, 0.0 }
   0x6   :  { %12 = vsyncpa [#allocation3], 0  ;;  %1026 = vmatpush3.bf16.msra.mxu0 %v1025_v8  ;;  %v812_v14 = vsel %vm147_vm0, %v804_v9, 0.0  ;;  %v1028_v15 = vpack.c.bf16 %v30_v7, %v29_v6  ;;  %v814_v16 = vsel %vm147_vm0, %v805_v10, 0.0  ;;  %v1216_v18 = vld [vmem:[%s1686_s3 + $0x20] sm:$0xff]  ;;  %v1221_v19 = vld [vmem:[%s1686_s3 + $0x28] sm:$0xff]  ;;  %270 = vperm.xlu0 %1082, %v52_v11  }
   0x7   :  { %v813_v17 = vadd.f32 %v812_v14, %v811_v12  ;;  %1027 = vmatprep.subr.bf16.mxu0 %v1144_v3  ;;  %v816_v20 = vsel %vm147_vm0, %v806_v13, 0.0  ;;  %vm1145_vm1 = vmmov 0   ;;  %v1146_v22 = vmov 0.0   ;;  %v35_v23 = vld [vmem:[%s1687_s4] sm:$0xff]  ;;  %v36_v24 = vld [vmem:[%s1687_s4 + $0x8] sm:$0xff]  ;;  %vm1233_vm2 = vmpackc.low %vm147_vm0, %vm147_vm0  ;;  %s1148_s30 = smov [#allocation2]  }
   0x8   :  { %986 = vmatprep.mubr.msk.f32.mxu0 %vm1145_vm1, %v1146_v22  ;;  %1021 = vmatprep.mubr.msk.f32.mxu1 %vm1145_vm1, %v1146_v22  ;;  %v1031_v26 = vpack.c.bf16 %v1221_v19, %v1216_v18  ;;  %v1037_v27 = vpack.c.bf16 %v36_v24, %v35_v23  ;;  %v836_v28 = vmul.f32 %v35_v23, %v35_v23  ;;  %v37_v30 = vld [vmem:[%s1687_s4 + $0x10] sm:$0xff]  ;;  %v38_v31 = vld [vmem:[%s1687_s4 + $0x18] sm:$0xff]  ;;  %v39_v37 = vld [vmem:[%s1687_s4 + $0x20] sm:$0xff]  ;;  %vm62_vm3 = vcmask 523264   ;;  %s906_s8 = sshll.u32 %s1148_s30, 4  ;;  %s907_s8 = int_to_ptr.vmem [resolvable:$true] %s906_s8 }
   0x9   :  { %v815_v21 = vadd.f32 %v814_v16, %v813_v17  ;;  %v837_v29 = vmul.f32 %v36_v24, %v36_v24  ;;  %v1252_v33 = vld [vmem:[%s1686_s3 + $0x30] sm:$0xff]  ;;  %v1257_v34 = vld [vmem:[%s1686_s3 + $0x38] sm:$0xff]  ;;  %v838_v35 = vmul.f32 %v37_v30, %v37_v30  ;;  %v839_v36 = vmul.f32 %v38_v31, %v38_v31  ;;  %v40_v43 = vld [vmem:[%s1687_s4 + $0x28] sm:$0xff]  ;;  %s1119_s9 = scalar_lea.vmem %s907_s8, 16  ;;  %s1123_s0 = scalar_lea.vmem %s907_s8, 32 }
   0xa   :  { %1029 = vmatpush3.bf16.msra.mxu0 %v1028_v15  ;;  %1039 = vmatpush3.bf16.xpose.msk.msra.mxu1 %vm1233_vm2, %v1037_v27  ;;  %v852_v38 = vsel %vm147_vm0, %v836_v28, 0.0  ;;  %v840_v40 = vmul.f32 %v39_v37, %v39_v37  ;;  %v1034_v44 = vpack.c.bf16 %v1257_v34, %v1252_v33  ;;  %v841_v46 = vmul.f32 %v40_v43, %v40_v43  ;;  %v41_v48 = vld [vmem:[%s1687_s4 + $0x30] sm:$0xff]  ;;  %v42_v53 = vld [vmem:[%s1687_s4 + $0x38] sm:$0xff]  ;;  %v43_v57 = vld [vmem:[%s1687_s4 + $0x40] sm:$0xff]  ;;  %p1120_p0 = scmp.ne.s32.totalorder %s907_s8, %s1119_s9  ;;  %p1124_p1 = scmp.lt.s32.totalorder %s907_s8, %s907_s8 }
   0xb   :  { %v1246_v32 = vadd.f32 %v816_v20, %v815_v21  ;;  %1030 = vmatprep.subr.bf16.mxu0 %v1144_v3  ;;  %v853_v39 = vsel %vm147_vm0, %v837_v29, 0.0  ;;  %1040 = vmatprep.subr.bf16.mxu1 %v1144_v3  ;;  %v855_v42 = vsel %vm147_vm0, %v838_v35, 0.0  ;;  %v857_v45 = vsel %vm147_vm0, %v839_v36, 0.0  ;;  %v44_v61 = vld [vmem:[%s1687_s4 + $0x48] sm:$0xff]  ;;  %v1310_v10 = vld [vmem:[%s1687_s4 + $0x50] sm:$0xff]  ;;  %v1315_v11 = vld [vmem:[%s1687_s4 + $0x58] sm:$0xff]  ;;  %p1125_p2 = scmp.lt.s32.totalorder %s1123_s0, %s1119_s9 }
   0xc   :  { %v854_v41 = vadd.f32 %v853_v39, %v852_v38  ;;  %v1041_v49 = vpack.c.bf16 %v38_v31, %v37_v30  ;;  %v859_v50 = vsel %vm147_vm0, %v840_v40, 0.0  ;;  %v842_v51 = vmul.f32 %v41_v48, %v41_v48  ;;  %v1325_v13 = vld [vmem:[%s1687_s4 + $0x60] sm:$0xff]  ;;  %v1330_v14 = vld [vmem:[%s1687_s4 + $0x68] sm:$0xff]  ;;  %v1340_v16 = vld [vmem:[%s1687_s4 + $0x70] sm:$0xff] }
   0xd   :  { %v861_v54 = vsel %vm147_vm0, %v841_v46, 0.0  ;;  %v843_v55 = vmul.f32 %v42_v53, %v42_v53  ;;  %v844_v59 = vmul.f32 %v43_v57, %v43_v57  ;;  %v845_v63 = vmul.f32 %v44_v61, %v44_v61  ;;  %v1345_v17 = vld [vmem:[%s1687_s4 + $0x78] sm:$0xff]  ;;  %v916_v24 = vld [vmem:[%s1688_s5] ss:$0 sm:$0xff]  ;;  %p1126_p3 = por %p1125_p2, %p1124_p1 }
   0xe   :  { %1032 = vmatpush3.bf16.msra.mxu0 %v1031_v26  ;;  %v856_v47 = vadd.f32 %v855_v42, %v854_v41  ;;  %v863_v58 = vsel %vm147_vm0, %v842_v51, 0.0  ;;  %v1045_v1 = vpack.c.bf16 %v40_v43, %v39_v37  ;;  %v1049_v8 = vpack.c.bf16 %v42_v53, %v41_v48  ;;  %v53_v25 = vld [vmem:[%s1685_s2] sm:$0xff] }
   0xf   :  { %1033 = vmatprep.subr.bf16.mxu0 %v1144_v3  ;;  %v865_v62 = vsel %vm147_vm0, %v843_v55, 0.0  ;;  %v867_v2 = vsel %vm147_vm0, %v844_v59, 0.0  ;;  %v869_v5 = vsel %vm147_vm0, %v845_v63, 0.0  ;;  %v1053_v9 = vpack.c.bf16 %v44_v61, %v43_v57  ;;  %p1127_p4 = pnand %p1126_p3, %p1120_p0 }
  0x10   :  { %v858_v52 = vadd.f32 %v857_v45, %v856_v47  ;;  %v1057_v12 = vpack.c.bf16 %v1315_v11, %v1310_v10  ;;  %v1061_v15 = vpack.c.bf16 %v1330_v14, %v1325_v13  ;;  %v1065_v20 = vpack.c.bf16 %v1345_v17, %v1340_v16 }
  0x11   :  { %v54_v21 = vlaneseq  ;;  %v1147_v51 = vmov 1966171168   ;;  %vm580_vm14 = vcmask 1041409   ;;  %vm582_vm15 = vcmask 1042434  }
  0x12   :  { %1035 = vmatpush3.bf16.msra.mxu0 %v1034_v44  ;;  %v860_v56 = vadd.f32 %v859_v50, %v858_v52  ;;  %1043 = vmatpush3.bf16.xpose.msk.msra.mxu1 %vm1233_vm2, %v1041_v49  ;;  %v371_v52 = vunpack.c.l.s4 %v1147_v51 }
  0x13   :  { %1044 = vmatprep.subr.bf16.mxu1 %v1144_v3  ;;  %v1351_v23 = vand.u32 127, %v54_v21  ;;  %v1360_v29 = vshrl.u32 %v54_v21, 7 }
  0x14   :  { %v862_v60 = vadd.f32 %v861_v54, %v860_v56  ;;  %v372_v55 = vunpack.c.0.s8 %v371_v52 }
  0x15   :  { %v1366_v30 = vsub.s32 0, %v1360_v29  ;;  %v297_v31 = vsub.s32 1, %v1360_v29  ;;  %v304_v35 = vsub.s32 2, %v1360_v29  ;;  %v318_v36 = vsub.s32 4, %v1360_v29 }
  0x16   :  { %v864_v0 = vadd.f32 %v863_v58, %v862_v60  ;;  %v311_v40 = vsub.s32 3, %v1360_v29  ;;  %v332_v42 = vsub.s32 6, %v1360_v29  ;;  %v325_v44 = vsub.s32 5, %v1360_v29 }
  0x17   :  { %v291_v37 = vrot.slane %v53_v25, %v1366_v30  ;;  %v305_v38 = vrot.slane %v53_v25, %v304_v35  ;;  %v298_v39 = vrot.slane %v53_v25, %v297_v31  ;;  %v319_v41 = vrot.slane %v53_v25, %v318_v36 }
  0x18   :  { %v866_v4 = vadd.f32 %v865_v62, %v864_v0  ;;  %v312_v43 = vrot.slane %v53_v25, %v311_v40  ;;  %v333_v45 = vrot.slane %v53_v25, %v332_v42  ;;  %v326_v46 = vrot.slane %v53_v25, %v325_v44 }
  0x19   :  { %293 = vbcast.lane.b32.xlu1 %v291_v37, 256  ;;  %307 = vbcast.lane.b32.xlu0 %v305_v38, 256  ;;  %v339_v47 = vsub.s32 7, %v1360_v29  ;;  %v375_v58 = vsub.s32 %v372_v55, %v1360_v29 }
  0x1a   :  { %v868_v6 = vadd.f32 %v867_v2, %v866_v4  ;;  %1047 = vmatpush3.bf16.xpose.msk.msra.mxu1 %vm1233_vm2, %v1045_v1 }
  0x1b   :  { %1048 = vmatprep.subr.bf16.mxu1 %v1144_v3  ;;  %v340_v48 = vrot.slane %v53_v25, %v339_v47 }
  0x1c   :  { %v1299_v7 = vadd.f32 %v869_v5, %v868_v6 }
  0x1d   :  { %300 = vbcast.lane.b32.xlu1 %v298_v39, 256  ;;  %321 = vbcast.lane.b32.xlu0 %v319_v41, 256 }
  0x21   :  { %314 = vbcast.lane.b32.xlu1 %v312_v43, 256  ;;  %335 = vbcast.lane.b32.xlu0 %v333_v45, 256 }
  0x22   :  { %1051 = vmatpush3.bf16.xpose.msk.msra.mxu1 %vm1233_vm2, %v1049_v8 }
  0x23   :  { %1052 = vmatprep.subr.bf16.mxu1 %v1144_v3 }
  0x25   :  { %328 = vbcast.lane.b32.xlu1 %v326_v46, 256 }
  0x29   :  { %342 = vbcast.lane.b32.xlu1 %v340_v48, 256 }
  0x2a   :  { %1055 = vmatpush3.bf16.xpose.msk.msra.mxu1 %vm1233_vm2, %v1053_v9 }
  0x2b   :  { %1056 = vmatprep.subr.bf16.mxu1 %v1144_v3 }
  0x32   :  { %1059 = vmatpush3.bf16.xpose.msk.msra.mxu1 %vm1233_vm2, %v1057_v12 }
  0x33   :  { %1060 = vmatprep.subr.bf16.mxu1 %v1144_v3 }
  0x3a   :  { %1063 = vmatpush3.bf16.xpose.msk.msra.mxu1 %vm1233_vm2, %v1061_v15 }
  0x3b   :  { %1064 = vmatprep.subr.bf16.mxu1 %v1144_v3 }
  0x42   :  { %1067 = vmatpush3.bf16.xpose.msk.msra.mxu1 %vm1233_vm2, %v1065_v20  ;;  %vm584_vm2 = vcmask 1043459  }
  0x81   :  { %v58_v3 = vpop.permute.xlu0 %57 }
  0x82   :  { %vm59_vm4 = vcmp.eq.s32.totalorder %v58_v3, %v1351_v23 }
  0x83   :  { %v914_v26 = vsel %vm59_vm4, 1.0, %v1146_v22 }
  0x84   :  { %987 = vmatmul.mubr.msk.f32.vlgmr.msra.gmra.mrb[0].mxu0 %vm62_vm3, %v914_v26  ;;  %v143_v27 = vmul.f32 %v916_v24, %v914_v26 }
  0x85   :  { %v1377_v54 = vpop.permute.xlu0 %270 }
  0x86   :  { %v1358_v28 = vsel %vm62_vm3, %v143_v27, 0.0  ;;  %vm272_vm12 = vcmp.eq.s32.totalorder %v1377_v54, %v1351_v23  ;;  %v935_v54 = vld [vmem:[%s1689_s6] ss:$0 sm:$0xff]  ;;  %vm586_vm3 = vcmask 1044484  }
  0x87   :  { %v934_v55 = vsel %vm272_vm12, 1.0, %v1146_v22  ;;  %vm590_vm12 = vcmask 1046534  }
  0x8b   :  { %v294_v53 = vpop.permute.xlu1 %293  ;;  %v308_v57 = vpop.permute.xlu0 %307 }
  0x8c   :  { %vm344_vm5 = vcmp.eq.s32.totalorder %v294_v53, %v1351_v23  ;;  %vm346_vm7 = vcmp.eq.s32.totalorder %v308_v57, %v1351_v23 }
  0x8d   :  { %v936_v5 = vsel %vm344_vm5, 1.0, %v1146_v22  ;;  %v938_v26 = vsel %vm346_vm7, 1.0, %v1146_v22 }
  0x8f   :  { %v301_v56 = vpop.permute.xlu1 %300  ;;  %v322_v0 = vpop.permute.xlu0 %321 }
  0x90   :  { %vm345_vm6 = vcmp.eq.s32.totalorder %v301_v56, %v1351_v23  ;;  %vm348_vm8 = vcmp.eq.s32.totalorder %v322_v0, %v1351_v23 }
  0x91   :  { %v937_v15 = vsel %vm345_vm6, 1.0, %v1146_v22  ;;  %v940_v38 = vsel %vm348_vm8, 1.0, %v1146_v22 }
  0x93   :  { %v315_v63 = vpop.permute.xlu1 %314  ;;  %v336_v25 = vpop.permute.xlu0 %335 }
  0x94   :  { %vm347_vm9 = vcmp.eq.s32.totalorder %v315_v63, %v1351_v23  ;;  %vm350_vm10 = vcmp.eq.s32.totalorder %v336_v25, %v1351_v23 }
  0x95   :  { %v939_v42 = vsel %vm347_vm9, 1.0, %v1146_v22  ;;  %v942_v45 = vsel %vm350_vm10, 1.0, %v1146_v22 }
  0x96   :  { %v488_v0 = vmul.f32 %v942_v45, %v935_v54 }
  0x97   :  { %v329_v27 = vpop.permute.xlu1 %328 }
  0x98   :  { %vm349_vm11 = vcmp.eq.s32.totalorder %v329_v27, %v1351_v23 }
  0x9b   :  { %v343_v46 = vpop.permute.xlu1 %342 }
  0x9c   :  { %vm351_vm13 = vcmp.eq.s32.totalorder %v343_v46, %v1351_v23 }
  0x9d   :  { %v943_v56 = vsel %vm351_vm13, 1.0, %v1146_v22 }
 0x157   :  { %v132_v49 = vpop.f32.mrb[0].mxu0 }
 0x158   :  { %v988_v50 = vpop.f32.mrb[1].mxu0  ;;  %1022 = vmatmul.mubr.msk.f32.vlgmr.msra.gmra.mrb[0].mxu1 %vm147_vm0, %v132_v49 }
 0x159   :  { %v941_v50 = vsel %vm349_vm11, 1.0, %v1146_v22  ;;  %v486_v22 = vmul.f32 %v940_v38, %v935_v54  ;;  %vm588_vm11 = vcmask 1045509  }
 0x15a   :  { %v487_v63 = vmul.f32 %v941_v50, %v935_v54 }
 0x22b   :  { %v265_v59 = vpop.f32.mrb[0].mxu1 }
 0x22c   :  { %v369_v60 = vcombine.high %v265_v59, %v265_v59  ;;  %v376_v61 = vrot.slane %v265_v59, %v375_v58  ;;  %v1023_v62 = vpop.f32.mrb[1].mxu1  ;;  %v275_v57 = vmul.f32 %v934_v55, %v265_v59  ;;  %v489_v59 = vmul.f32 %v943_v56, %v935_v54 }
 0x22d   :  { %v485_v62 = vmul.f32 %v939_v42, %v935_v54 }
 0x22e   :  { %v383_v1 = vrot.slane %v369_v60, %v375_v58  ;;  %v384_v2 = vcombine.high %v376_v61, %v376_v61  ;;  %v392_v4 = vrot.slane %v376_v61, %v375_v58  ;;  %v483_v60 = vmul.f32 %v937_v15, %v935_v54 }
 0x22f   :  { %v482_v61 = vmul.f32 %v936_v5, %v935_v54 }
 0x230   :  { %v421_v6 = vrot.slane %v392_v4, %v1366_v30  ;;  %v406_v8 = vrot.slane %v384_v2, %v375_v58  ;;  %v414_v9 = vcombine.high %v392_v4, %v392_v4  ;;  %v399_v12 = vrot.slane %v383_v1, %v375_v58 }
 0x231   :  { %v385_v24 = vcombine.high %v383_v1, %v383_v1  ;;  %v285_v1 = vmul.f32 %v935_v54, %v934_v55  ;;  %v807_v2 = vmul.f32 %v1216_v18, %v1216_v18  ;;  %v808_v4 = vmul.f32 %v1221_v19, %v1221_v19 }
 0x232   :  { %v458_v20 = vmul.f32 %v936_v5, %v421_v6  ;;  %v425_v21 = vrot.slane %v406_v8, %v1366_v30  ;;  %v429_v3 = vrot.slane %v414_v9, %v1366_v30  ;;  %v416_v31 = vcombine.high %v406_v8, %v406_v8 }
 0x233   :  { %v437_v36 = vrot.slane %v399_v12, %v1366_v30  ;;  %v415_v37 = vcombine.high %v399_v12, %v399_v12  ;;  %v413_v41 = vrot.slane %v385_v24, %v375_v58  ;;  %v818_v5 = vsel %vm147_vm0, %v807_v2, 0.0 }
 0x234   :  { %466 = vadd.xlane.f32.xlu0 %v458_v20  ;;  %v459_v35 = vmul.f32 %v937_v15, %v425_v21  ;;  %v460_v39 = vmul.f32 %v938_v26, %v429_v3  ;;  %v433_v40 = vrot.slane %v416_v31, %v1366_v30  ;;  %v809_v6 = vmul.f32 %v1252_v33, %v1252_v33 }
 0x235   :  { %v462_v43 = vmul.f32 %v940_v38, %v437_v36  ;;  %v445_v44 = vrot.slane %v415_v37, %v1366_v30  ;;  %v441_v48 = vrot.slane %v413_v41, %v1366_v30  ;;  %v417_v49 = vcombine.high %v413_v41, %v413_v41 }
 0x236   :  { %468 = vadd.xlane.f32.xlu1 %v459_v35  ;;  %v461_v47 = vmul.f32 %v939_v42, %v433_v40  ;;  %v846_v8 = vmul.f32 %v1310_v10, %v1310_v10  ;;  %v819_v9 = vadd.f32 %v818_v5, %v1246_v32  ;;  %v820_v12 = vsel %vm147_vm0, %v808_v4, 0.0 }
 0x237   :  { %v464_v51 = vmul.f32 %v942_v45, %v445_v44  ;;  %v463_v52 = vmul.f32 %v941_v50, %v441_v48  ;;  %v449_v53 = vrot.slane %v417_v49, %v1366_v30  ;;  %v484_v30 = vmul.f32 %v938_v26, %v935_v54 }
 0x238   :  { %470 = vadd.xlane.f32.xlu0 %v460_v39  ;;  %v822_v18 = vsel %vm147_vm0, %v809_v6, 0.0  ;;  %v871_v15 = vsel %vm147_vm0, %v846_v8, 0.0  ;;  %v848_v19 = vmul.f32 %v1325_v13, %v1325_v13  ;;  %v821_v20 = vadd.f32 %v820_v12, %v819_v9 }
 0x239   :  { %v465_v58 = vmul.f32 %v943_v56, %v449_v53  ;;  %v872_v33 = vadd.f32 %v871_v15, %v1299_v7  ;;  %v1477_v5 = vsub.s32 %v1351_v23, %v1360_v29  ;;  %v1488_v15 = vmul.f32 %v1330_v14, %v1330_v14 }
 0x23a   :  { %474 = vadd.xlane.f32.xlu1 %v462_v43  ;;  %v1428_v21 = vadd.f32 %v822_v18, %v821_v20  ;;  %v875_v32 = vsel %vm147_vm0, %v848_v19, 0.0 }
 0x23c   :  { %472 = vadd.xlane.f32.xlu0 %v461_v47 }
 0x23e   :  { %478 = vadd.xlane.f32.xlu1 %v464_v51 }
 0x240   :  { %476 = vadd.xlane.f32.xlu0 %v463_v52 }
 0x242   :  { %276 = vadd.xlane.f32.xlu1 %v275_v57 }
 0x244   :  { %480 = vadd.xlane.f32.xlu0 %v465_v58 }
 0x246   :  { %492 = vadd.xlane.f32.xlu1 %v483_v60 }
 0x248   :  { %490 = vadd.xlane.f32.xlu0 %v482_v61 }
 0x24a   :  { %496 = vadd.xlane.f32.xlu1 %v485_v62 }
 0x24c   :  { %494 = vadd.xlane.f32.xlu0 %v484_v30 }
 0x24e   :  { %500 = vadd.xlane.f32.xlu1 %v487_v63 }
 0x250   :  { %498 = vadd.xlane.f32.xlu0 %v486_v22 }
 0x252   :  { %504 = vadd.xlane.f32.xlu1 %v489_v59 }
 0x254   :  { %502 = vadd.xlane.f32.xlu0 %v488_v0 }
 0x256   :  { %286 = vadd.xlane.f32.xlu1 %v285_v1 }
 0x258   :  { %145 = vadd.xlane.f32.xlu0 %v1358_v28  ;;  %v847_v28 = vmul.f32 %v1315_v11, %v1315_v11 }
 0x25a   :  { %v873_v10 = vsel %vm147_vm0, %v847_v28, 0.0 }
 0x25b   :  { %v874_v3 = vadd.f32 %v873_v10, %v872_v33 }
 0x25d   :  { %v1433_v24 = vadd.f32 %v875_v32, %v874_v3 }
 0x2c1   :  { %v1435_v11 = vpop.xlane.xlu0 %466 }
 0x2c2   :  { %v621_v26 = vand.u32 2147483647, %v1435_v11  ;;  %v597_v28 = vmax.f32 %v1435_v11, 0.0  ;;  %vm605_vm5 = vcmp.ne.f32.partialorder %v1435_v11, %v1435_v11 }
 0x2c3   :  { %v1438_v27 = vpop.xlane.xlu1 %468 }
 0x2c4   :  { %v629_v25 = vsub.f32 0.0, %v621_v26  ;;  %v622_v13 = vand.u32 2147483647, %v1438_v27  ;;  %v598_v19 = vmax.f32 %v1438_v27, 0.0  ;;  %vm606_vm4 = vcmp.ne.f32.partialorder %v1438_v27, %v1438_v27 }
 0x2c5   :  { %v1441_v31 = vpop.xlane.xlu0 %470 }
 0x2c6   :  { %v637_v35 = vmul.f32 1.442695, %v629_v25  ;;  %v630_v7 = vsub.f32 0.0, %v622_v13  ;;  %v623_v36 = vand.u32 2147483647, %v1441_v31  ;;  %v599_v32 = vmax.f32 %v1441_v31, 0.0 }
 0x2c7   :  { %v1444_v37 = vpop.xlane.xlu1 %474  ;;  %vm607_vm8 = vcmp.ne.f32.partialorder %v1441_v31, %v1441_v31 }
 0x2c8   :  { %1083 = vpow2.f32 %v637_v35  ;;  %v639_v38 = vmul.f32 1.442695, %v630_v7  ;;  %v631_v39 = vsub.f32 0.0, %v623_v36  ;;  %v625_v40 = vand.u32 2147483647, %v1444_v37 }
 0x2c9   :  { %v1447_v41 = vpop.xlane.xlu0 %472  ;;  %v601_v25 = vmax.f32 %v1444_v37, 0.0 }
 0x2ca   :  { %1085 = vpow2.f32 %v639_v38  ;;  %v624_v42 = vand.u32 2147483647, %v1447_v41  ;;  %v641_v43 = vmul.f32 1.442695, %v631_v39  ;;  %v633_v44 = vsub.f32 0.0, %v625_v40 }
 0x2cb   :  { %v1450_v45 = vpop.xlane.xlu1 %478  ;;  %v600_v14 = vmax.f32 %v1447_v41, 0.0  ;;  %vm608_vm9 = vcmp.ne.f32.partialorder %v1447_v41, %v1447_v41 }
 0x2cc   :  { %v632_v46 = vsub.f32 0.0, %v624_v42  ;;  %v627_v47 = vand.u32 2147483647, %v1450_v45  ;;  %1087 = vpow2.f32 %v641_v43  ;;  %v645_v48 = vmul.f32 1.442695, %v633_v44 }
 0x2cd   :  { %v1453_v49 = vpop.xlane.xlu0 %476  ;;  %v603_v13 = vmax.f32 %v1450_v45, 0.0 }
 0x2ce   :  { %v643_v50 = vmul.f32 1.442695, %v632_v46  ;;  %v635_v51 = vsub.f32 0.0, %v627_v47  ;;  %1089 = vpow2.f32 %v645_v48  ;;  %v626_v52 = vand.u32 2147483647, %v1453_v49 }
 0x2cf   :  { %v277_v56 = vpop.xlane.xlu1 %276  ;;  %v602_v36 = vmax.f32 %v1453_v49, 0.0 }
 0x2d0   :  { %1091 = vpow2.f32 %v643_v50  ;;  %v649_v53 = vmul.f32 1.442695, %v635_v51  ;;  %v634_v55 = vsub.f32 0.0, %v626_v52  ;;  %v1463_v62 = vsub.f32 0.0, %v277_v56 }
 0x2d1   :  { %v1458_v58 = vpop.xlane.xlu0 %480 }
 0x2d2   :  { %v1456_v57 = vpop.eup %1083  ;;  %1093 = vpow2.f32 %v649_v53  ;;  %v647_v60 = vmul.f32 1.442695, %v634_v55  ;;  %v628_v63 = vand.u32 2147483647, %v1458_v58  ;;  %v512_v0 = vand.u32 2147483647, %v1463_v62 }
 0x2d3   :  { %v653_v54 = vadd.f32 1.0, %v1456_v57  ;;  %v493_v20 = vpop.xlane.xlu1 %492  ;;  %v656_v33 = vmul.f32 -0.5, %v1456_v57  ;;  %v659_v10 = vand.u32 2147483647, %v1456_v57 }
 0x2d4   :  { %v1461_v61 = vpop.eup %1085  ;;  %v636_v2 = vsub.f32 0.0, %v628_v63  ;;  %v513_v18 = vsub.f32 0.0, %v512_v0  ;;  %v555_v39 = vrot.slane %v493_v20, %v1477_v5 }
 0x2d5   :  { %1095 = vlog2.f32 %v653_v54  ;;  %v662_v30 = vadd.f32 1.0, %v1461_v61  ;;  %v1481_v9 = vpop.xlane.xlu0 %490  ;;  %v665_v23 = vmul.f32 -0.5, %v1461_v61  ;;  %v657_v47 = vadd.f32 1.0, %v656_v33 }
 0x2d6   :  { %1097 = vpow2.f32 %v647_v60  ;;  %v1467_v22 = vpop.eup %1087  ;;  %v651_v29 = vmul.f32 1.442695, %v636_v2  ;;  %v514_v38 = vmul.f32 1.442695, %v513_v18  ;;  %vm1506_vm1 = vcmp.lt.f32.partialorder %v659_v10, 0.0004427343 }
 0x2d7   :  { %1099 = vlog2.f32 %v662_v30  ;;  %v671_v59 = vadd.f32 1.0, %v1467_v22  ;;  %v674_v7 = vmul.f32 -0.5, %v1467_v22  ;;  %v666_v42 = vadd.f32 1.0, %v665_v23 }
 0x2d8   :  { %v1471_v1 = vpop.eup %1089  ;;  %v668_v50 = vand.u32 2147483647, %v1461_v61  ;;  %v677_v52 = vand.u32 2147483647, %v1467_v22  ;;  %v551_v53 = vrot.slane %v1481_v9, %v1477_v5  ;;  %v658_v2 = vmul.f32 %v1456_v57, %v657_v47  ;;  %v497_v57 = vpop.xlane.xlu1 %496 }
 0x2d9   :  { %1101 = vlog2.f32 %v671_v59  ;;  %v689_v6 = vadd.f32 1.0, %v1471_v1  ;;  %v495_v46 = vpop.xlane.xlu0 %494  ;;  %v675_v54 = vadd.f32 1.0, %v674_v7  ;;  %v692_v60 = vmul.f32 -0.5, %v1471_v1 }
 0x2da   :  { %v1473_v4 = vpop.eup %1091  ;;  %v667_v30 = vmul.f32 %v1461_v61, %v666_v42  ;;  %vm1523_vm6 = vcmp.lt.f32.partialorder %v668_v50, 0.0004427343  ;;  %v559_v9 = vrot.slane %v495_v46, %v1477_v5  ;;  %vm1530_vm7 = vcmp.lt.f32.partialorder %v677_v52, 0.0004427343 }
 0x2db   :  { %v680_v8 = vadd.f32 1.0, %v1473_v4  ;;  %v683_v43 = vmul.f32 -0.5, %v1473_v4  ;;  %v686_v59 = vand.u32 2147483647, %v1473_v4  ;;  %v581_v20 = vsel %vm580_vm14, %v555_v39, %v551_v53 }
 0x2dc   :  { %v1483_v12 = vpop.eup %1093  ;;  %v563_v46 = vrot.slane %v497_v57, %v1477_v5  ;;  %v583_v47 = vsel %vm582_vm15, %v559_v9, %v581_v20 }
 0x2dd   :  { %1103 = vlog2.f32 %v680_v8  ;;  %v707_v3 = vadd.f32 1.0, %v1483_v12  ;;  %v684_v63 = vadd.f32 1.0, %v683_v43  ;;  %v499_v33 = vpop.xlane.xlu0 %498  ;;  %vm1544_vm10 = vcmp.lt.f32.partialorder %v686_v59, 0.0004427343  ;;  %v501_v59 = vpop.xlane.xlu1 %500 }
 0x2de   :  { %1105 = vlog2.f32 %v689_v6  ;;  %v710_v42 = vmul.f32 -0.5, %v1483_v12  ;;  %v713_v9 = vand.u32 2147483647, %v1483_v12 }
 0x2df   :  { %v1096_v26 = vpop.eup %1095  ;;  %1107 = vpow2.f32 %v651_v29  ;;  %v695_v29 = vand.u32 2147483647, %v1471_v1 }
 0x2e0   :  { %v1499_v35 = vpop.eup %1097  ;;  %1109 = vlog2.f32 %v707_v3  ;;  %v655_v56 = vmul.f32 0.6931472, %v1096_v26  ;;  %v676_v3 = vmul.f32 %v1467_v22, %v675_v54  ;;  %v693_v26 = vadd.f32 1.0, %v692_v60 }
 0x2e1   :  { %v1100_v40 = vpop.eup %1099  ;;  %v698_v44 = vadd.f32 1.0, %v1499_v35  ;;  %v701_v0 = vmul.f32 -0.5, %v1499_v35  ;;  %vm1564_vm13 = vcmp.lt.f32.partialorder %v695_v29, 0.0004427343 }
 0x2e2   :  { %v664_v51 = vmul.f32 0.6931472, %v1100_v40  ;;  %v661_v10 = vsel %vm1506_vm1, %v658_v2, %v655_v56  ;;  %v685_v40 = vmul.f32 %v1473_v4, %v684_v63  ;;  %v503_v2 = vpop.xlane.xlu0 %502  ;;  %vm592_vm1 = vcmask 1047559  }
 0x2e3   :  { %1111 = vlog2.f32 %v698_v44  ;;  %v1102_v55 = vpop.eup %1101  ;;  %v702_v43 = vadd.f32 1.0, %v701_v0  ;;  %v725_v48 = vadd.f32 %v661_v10, %v597_v28  ;;  %v585_v0 = vsel %vm584_vm2, %v563_v46, %v583_v47 }
 0x2e4   :  { %1113 = vpow2.f32 %v514_v38  ;;  %v673_v8 = vmul.f32 0.6931472, %v1102_v55  ;;  %v670_v61 = vsel %vm1523_vm6, %v667_v30, %v664_v51  ;;  %v704_v51 = vand.u32 2147483647, %v1499_v35 }
 0x2e5   :  { %v726_v44 = vadd.f32 %v670_v61, %v598_v19  ;;  %v567_v19 = vrot.slane %v499_v33, %v1477_v5  ;;  %v694_v55 = vmul.f32 %v1471_v1, %v693_v26  ;;  %v711_v30 = vadd.f32 1.0, %v710_v42 }
 0x2e6   :  { %v679_v22 = vsel %vm1530_vm7, %v676_v3, %v673_v8  ;;  %v703_v63 = vmul.f32 %v1499_v35, %v702_v43  ;;  %vm609_vm6 = vcmp.ne.f32.partialorder %v1444_v37, %v1444_v37  ;;  %v733_v35 = vsel %vm605_vm5, %v1435_v11, %v725_v48 }
 0x2e7   :  { %v1104_v18 = vpop.eup %1103  ;;  %v727_v28 = vadd.f32 %v679_v22, %v599_v32  ;;  %v734_v1 = vsel %vm606_vm4, %v1438_v27, %v726_v44  ;;  %vm705_vm7 = vcmp.lt.f32.partialorder %v704_v51, 0.0004427343  ;;  %v575_v29 = vrot.slane %v503_v2, %v1477_v5 }
 0x2e8   :  { %v682_v7 = vmul.f32 0.6931472, %v1104_v18  ;;  %v1106_v38 = vpop.eup %1105  ;;  %v587_v18 = vsel %vm586_vm3, %v567_v19, %v585_v0  ;;  %v712_v10 = vmul.f32 %v1483_v12, %v711_v30  ;;  %v571_v26 = vrot.slane %v501_v59, %v1477_v5 }
 0x2e9   :  { %v1555_v4 = vpop.eup %1107  ;;  %v691_v53 = vmul.f32 0.6931472, %v1106_v38  ;;  %v735_v20 = vsel %vm607_vm8, %v1441_v31, %v727_v28  ;;  %vm1610_vm4 = vcmp.lt.f32.partialorder %v713_v9, 0.0004427343  ;;  %vm610_vm5 = vcmp.ne.f32.partialorder %v1453_v49, %v1453_v49 }
 0x2ea   :  { %v688_v50 = vsel %vm1544_vm10, %v685_v40, %v682_v7  ;;  %v1110_v52 = vpop.eup %1109  ;;  %v716_v54 = vadd.f32 1.0, %v1555_v4  ;;  %v719_v11 = vmul.f32 -0.5, %v1555_v4  ;;  %v752_v7 = vrot.slane %v733_v35, %v1477_v5  ;;  %v505_v40 = vpop.xlane.xlu1 %504 }
 0x2eb   :  { %v728_v32 = vadd.f32 %v688_v50, %v600_v14  ;;  %v697_v27 = vsel %vm1564_vm13, %v694_v55, %v691_v53  ;;  %v709_v61 = vmul.f32 0.6931472, %v1110_v52  ;;  %v756_v14 = vrot.slane %v734_v1, %v1477_v5 }
 0x2ec   :  { %1115 = vlog2.f32 %v716_v54  ;;  %v729_v31 = vadd.f32 %v697_v27, %v601_v25  ;;  %v720_v42 = vadd.f32 1.0, %v719_v11  ;;  %v722_v22 = vand.u32 2147483647, %v1555_v4  ;;  %v146_v54 = vpop.xlane.xlu0 %145 }
 0x2ed   :  { %v1112_v60 = vpop.eup %1111  ;;  %v736_v33 = vsel %vm608_vm9, %v1447_v41, %v728_v32  ;;  %v760_v41 = vrot.slane %v735_v20, %v1477_v5  ;;  %v715_v12 = vsel %vm1610_vm4, %v712_v10, %v709_v61  ;;  %v781_v25 = vsel %vm580_vm14, %v756_v14, %v752_v7 }
 0x2ee   :  { %v1573_v6 = vpop.eup %1113  ;;  %v700_v8 = vmul.f32 0.6931472, %v1112_v60  ;;  %v764_v39 = vrot.slane %v736_v33, %v1477_v5  ;;  %v579_v46 = vrot.slane %v505_v40, %v1477_v5  ;;  %v737_v48 = vsel %vm609_vm6, %v1444_v37, %v729_v31  ;;  %v287_v2 = vpop.xlane.xlu1 %286 }
 0x2ef   :  { %v516_v57 = vadd.f32 1.0, %v1573_v6  ;;  %v519_v47 = vmul.f32 -0.5, %v1573_v6  ;;  %v731_v50 = vadd.f32 %v715_v12, %v603_v13  ;;  %v850_v51 = vmul.f32 %v1340_v16, %v1340_v16 }
 0x2f0   :  { %v706_v23 = vsel %vm705_vm7, %v703_v63, %v700_v8  ;;  %vm611_vm14 = vcmp.ne.f32.partialorder %v1450_v45, %v1450_v45  ;;  %v877_v53 = vsel %vm147_vm0, %v1488_v15, 0.0  ;;  %v721_v56 = vmul.f32 %v1555_v4, %v720_v42 }
 0x2f1   :  { %v730_v3 = vadd.f32 %v706_v23, %v602_v36  ;;  %1117 = vlog2.f32 %v516_v57  ;;  %v589_v36 = vsel %vm588_vm11, %v571_v26, %v587_v18  ;;  %v768_v16 = vrot.slane %v737_v48, %v1477_v5 }
 0x2f2   :  { %v591_v43 = vsel %vm590_vm12, %v575_v29, %v589_v36  ;;  %v604_v60 = vmax.f32 %v1458_v58, 0.0  ;;  %vm723_vm8 = vcmp.lt.f32.partialorder %v722_v22, 0.0004427343  ;;  %v520_v28 = vadd.f32 1.0, %v519_v47 }
 0x2f3   :  { %v738_v44 = vsel %vm610_vm5, %v1453_v49, %v730_v3  ;;  %v782_v49 = vsel %vm582_vm15, %v760_v41, %v781_v25  ;;  %v593_v52 = vsel %vm592_vm1, %v579_v46, %v591_v43  ;;  %v739_v30 = vsel %vm611_vm14, %v1450_v45, %v731_v50 }
 0x2f4   :  { %v772_v55 = vrot.slane %v738_v44, %v1477_v5  ;;  %v783_v13 = vsel %vm584_vm2, %v764_v39, %v782_v49  ;;  %v522_v59 = vand.u32 2147483647, %v1573_v6  ;;  %v851_v15 = vmul.f32 %v1345_v17, %v1345_v17 }
 0x2f5   :  { %v784_v4 = vsel %vm586_vm3, %v768_v16, %v783_v13  ;;  %v595_v1 = vmul.f32 %v593_v52, %v146_v54  ;;  %v879_v32 = vsel %vm147_vm0, %v850_v51, 0.0  ;;  %vm612_vm15 = vcmp.ne.f32.partialorder %v1458_v58, %v1458_v58 }
 0x2f6   :  { %v1116_v19 = vpop.eup %1115  ;;  %v506_v35 = vmul.f32 %v287_v2, %v146_v54  ;;  %v785_v45 = vsel %vm588_vm11, %v772_v55, %v784_v4  ;;  %v878_v9 = vadd.f32 %v877_v53, %v1433_v24  ;;  %v776_v18 = vrot.slane %v739_v30, %v1477_v5 }
 0x2f7   :  { %v718_v37 = vmul.f32 0.6931472, %v1116_v19  ;;  %v521_v61 = vmul.f32 %v1573_v6, %v520_v28  ;;  %v509_v23 = vmax.f32 %v1463_v62, 0.0  ;;  %vm523_vm2 = vcmp.lt.f32.partialorder %v522_v59, 0.0004427343 }
 0x2f8   :  { %v596_v14 = vadd.f32 1e-06, %v595_v1  ;;  %v786_v11 = vsel %vm590_vm12, %v776_v18, %v785_v45  ;;  %v810_v57 = vmul.f32 %v1257_v34, %v1257_v34  ;;  %vm790_vm3 = vcmask 64512  }
 0x2f9   :  { %v724_v63 = vsel %vm723_vm8, %v721_v56, %v718_v37  ;;  %v507_v10 = vadd.f32 1e-06, %v506_v35  ;;  %vm510_vm9 = vcmp.ne.f32.partialorder %v1463_v62, %v1463_v62  ;;  %vm528_vm10 = vcmask 7168  }
 0x2fa   :  { %v732_v0 = vadd.f32 %v724_v63, %v604_v60  ;;  %v824_v31 = vsel %vm147_vm0, %v810_v57, 0.0 }
 0x2fb   :  { %v1118_v8 = vpop.eup %1117  ;;  %v825_v40 = vadd.f32 %v824_v31, %v1428_v21 }
 0x2fc   :  { %v740_v17 = vsel %vm612_vm15, %v1458_v58, %v732_v0  ;;  %v518_v27 = vmul.f32 0.6931472, %v1118_v8  ;;  %v880_v58 = vadd.f32 %v879_v32, %v878_v9 }
 0x2fd   :  { %v780_v29 = vrot.slane %v740_v17, %v1477_v5  ;;  %v881_v5 = vsel %vm147_vm0, %v851_v15, 0.0  ;;  %vm898_vm0 = vcmask 0  }
 0x2fe   :  { %v524_v20 = vsel %vm523_vm2, %v521_v61, %v518_v27  ;;  %v882_v34 = vadd.f32 %v881_v5, %v880_v58 }
 0x2ff   :  { %v525_v24 = vadd.f32 %v524_v20, %v509_v23  ;;  %v787_v33 = vsel %vm592_vm1, %v780_v29, %v786_v11 }
 0x300   :  { %v789_v6 = vmul.f32 %v787_v33, %v596_v14 }
 0x301   :  { %v526_v3 = vsel %vm510_vm9, %v1463_v62, %v525_v24 }
 0x302   :  { %v527_v26 = vmul.f32 %v526_v3, %v507_v10  ;;  %v791_v7 = vsel %vm790_vm3, %v789_v6, 0.0 }
 0x303   :  { %792 = vadd.xlane.f32.xlu1 %v791_v7 }
 0x304   :  { %v529_v38 = vsel %vm528_vm10, %v527_v26, 0.0 }
 0x305   :  { %530 = vadd.xlane.f32.xlu0 %v529_v38 }
 0x307   :  { %883 = vadd.xlane.f32.xlu1 %v882_v34 }
 0x309   :  { %826 = vadd.xlane.f32.xlu0 %v825_v40 }
 0x390   :  { %v793_v41 = vpop.xlane.xlu1 %792 }
 0x391   :  { %v794_v12 = vrot.slane %v793_v41, 4 }
 0x392   :  { %v531_v36 = vpop.xlane.xlu0 %530 }
 0x393   :  { %v532_v39 = vrot.slane %v531_v36, 4  ;;  %v795_v42 = vadd.f32 %v794_v12, %v793_v41 }
 0x394   :  { %v884_v25 = vpop.xlane.xlu1 %883 }
 0x395   :  { %v533_v62 = vadd.f32 %v532_v39, %v531_v36  ;;  %v796_v43 = vrot.slane %v795_v42, 2  ;;  %v885_v44 = vrot.slane %v884_v25, 4 }
 0x396   :  { %v827_v22 = vpop.xlane.xlu0 %826 }
 0x397   :  { %v534_v46 = vrot.slane %v533_v62, 2  ;;  %v828_v47 = vrot.slane %v827_v22, 4  ;;  %v886_v48 = vadd.f32 %v885_v44, %v884_v25  ;;  %v797_v50 = vadd.f32 %v796_v43, %v795_v42 }
 0x399   :  { %v829_v51 = vadd.f32 %v828_v47, %v827_v22  ;;  %v887_v19 = vrot.slane %v886_v48, 2  ;;  %v535_v49 = vadd.f32 %v534_v46, %v533_v62  ;;  %v798_v21 = vrot.slane %v797_v50, 1 }
 0x39b   :  { %v830_v52 = vrot.slane %v829_v51, 2  ;;  %v888_v53 = vadd.f32 %v887_v19, %v886_v48  ;;  %v536_v55 = vrot.slane %v535_v49, 1  ;;  %v799_v37 = vadd.f32 %v798_v21, %v797_v50 }
 0x39d   :  { %v831_v56 = vadd.f32 %v830_v52, %v829_v51  ;;  %v537_v13 = vadd.f32 %v536_v55, %v535_v49  ;;  %v889_v54 = vrot.slane %v888_v53, 1 }
 0x39f   :  { %1068 = vpush %v537_v13  ;;  %v832_v16 = vrot.slane %v831_v56, 1  ;;  %v890_v60 = vadd.f32 %v889_v54, %v888_v53 }
 0x3a0   :  { %1070 = vpush %v799_v37 }
 0x3a1   :  { %v833_v28 = vadd.f32 %v832_v16, %v831_v56 }
 0x3a3   :  { %1072 = vpush %v833_v28 }
 0x3a4   :  { %1074 = vpush %v890_v60 }
 0x3d0   :  { %s1069_s6 = spop %1068 }
 0x3d1   :  { %s1071_s28 = spop %1070  ;;  %v539_v2 = vstv %s1069_s6 }
 0x3d2   :  { %v801_v30 = vstv %s1071_s28 }
 0x3d3   :  { %v802_v15 = vmul.f32 1.25, %v801_v30 }
 0x3d4   :  { %s1073_s3 = spop %1072 }
 0x3d5   :  { %s1075_s29 = spop %1074  ;;  %v835_v63 = vstv %s1073_s3  ;;  %v895_v1 = vadd.f32 %v802_v15, %v539_v2 }
 0x3d6   :  { %v892_v59 = vstv %s1075_s29 }
 0x3d7   :  { %v893_v0 = vadd.f32 %v892_v59, %v835_v63 }
 0x3d9   :  { %v894_v4 = vmul.f32 0.5, %v893_v0 }
 0x3db   :  { %v896_v32 = vmul.f32 0.0001, %v894_v4 }
 0x3dd   :  { %v897_v8 = vadd.f32 %v896_v32, %v895_v1 }
 0x3df   :  { %899 = vst.msk [vmem:[#allocation2] sm:$0x1] %vm898_vm0, %v897_v8 }
 0x3e0   :  { %1130 = shalt.err (!%p1127_p4)
}
 0x3e1   :  { %s1131_s12 = scalar_lea.hbm %s1690_s7, 16 }
 0x3e2   :  { %p1132_p5 = scmp.ne.s32.totalorder %s1690_s7, %s1131_s12  ;;  %p1135_p6 = scmp.lt.u32.totalorder %s1131_s12, %s1690_s7 }
 0x3e4   :  { %p1137_p7 = pnand %p1135_p6, %p1132_p5 }
 0x3e6   :  { %1140 = shalt.err (!%p1137_p7)
}
 0x3e7   :  { %909 = dma.vmem_to_hbm [thread:$0]  %s907_s8, 16, %s1690_s7, [#allocation3]  }
 0x3e8   :  { %1141 = dma.done.wait [#allocation3], 16  }
 0x3e9   :  { %1142 = vsyncadd [#allocation3], 4294967280 }
 0x3ea   :  { %913 = vsyncpa [#allocation3], 1 }

</bundles_post_ra>
